<compile_context>
chip_gen: v5e
topology: v5e:2x2
jax: 0.10.0
libtpu: 0.0.40
codegen_flags: <defaults>
</compile_context>

<pallas_src>
import jax
import jax.numpy as jnp
from jax.experimental import pallas as pl
from jax.experimental.pallas import tpu as pltpu

HIDDEN1 = 64
HIDDEN2 = 32
LANE = 128
SUBLANE_BF16 = 16


def _round_up(x, m):
    return ((x + m - 1) // m) * m


def dqn_kernel(x_ref, w1_ref, w2_ref, w3_ref, b_ref, o_ref):
    """relu(x@W1+b1) -> relu(.@W2+b2) -> .@W3+b3 for one batch tile.

    x_ref:  (TB, n_obs)        f32   (cast to bf16 in-kernel)
    w1_ref: (n_obs, 64)        bf16  (resident across grid steps)
    w2_ref: (64, 32)           bf16  (resident)
    w3_ref: (32, n_actions)    bf16  (resident, un-padded)
    b_ref:  (3, 128)           f32   row0=b1, row1=b2, row2=b3 (zero-extended)
    o_ref:  (TB, n_actions)    f32
    """
    n_act = o_ref.shape[1]

    # Layer 1: Linear(n_obs -> 64) + ReLU  (bf16 MXU inputs, f32 accumulate)
    x = x_ref[...].astype(jnp.bfloat16)
    h1 = jnp.dot(x, w1_ref[...], preferred_element_type=jnp.float32)
    h1 = jnp.maximum(h1 + b_ref[0:1, 0:HIDDEN1], 0.0).astype(jnp.bfloat16)

    # Layer 2: Linear(64 -> 32) + ReLU
    h2 = jnp.dot(h1, w2_ref[...], preferred_element_type=jnp.float32)
    h2 = jnp.maximum(h2 + b_ref[1:2, 0:HIDDEN2], 0.0).astype(jnp.bfloat16)

    # Layer 3: Linear(32 -> n_actions), no activation
    h3 = jnp.dot(h2, w3_ref[...], preferred_element_type=jnp.float32)
    o_ref[...] = (h3 + b_ref[2:3, 0:n_act]).astype(o_ref.dtype)


def _choose_tile(batch):
    """Pick a batch tile size (static, derived from static shapes)."""
    if batch < 512:
        # Small RL batches: a single tile, padded only to the bf16 sublane multiple.
        return _round_up(max(batch, 1), SUBLANE_BF16)
    # Large batches: >= 2 tiles so both v7x TensorCores get work; cap tile at 1024
    # rows to amortize per-step overhead while keeping VMEM tiny on all gens.
    return min(_round_up((batch + 1) // 2, SUBLANE_BF16), 1024)


@jax.jit
def dqn_forward(x, packed_params):
    """Run the fused MLP over an arbitrary batch size. x: (batch, n_obs) f32."""
    w1, w2, w3, b_packed = packed_params
    batch, n_obs = x.shape
    n_actions = w3.shape[1]

    tb = _choose_tile(batch)
    padded_batch = _round_up(batch, tb)
    if padded_batch != batch:
        x = jnp.pad(x, ((0, padded_batch - batch), (0, 0)))

    out = pl.pallas_call(
        dqn_kernel,
        out_shape=jax.ShapeDtypeStruct((padded_batch, n_actions), jnp.float32),
        grid=(padded_batch // tb,),
        in_specs=[
            pl.BlockSpec((tb, n_obs), lambda i: (i, 0)),            # x: tiled over batch
            pl.BlockSpec((n_obs, HIDDEN1), lambda i: (0, 0)),        # W1: resident
            pl.BlockSpec((HIDDEN1, HIDDEN2), lambda i: (0, 0)),      # W2: resident
            pl.BlockSpec((HIDDEN2, n_actions), lambda i: (0, 0)),    # W3: resident
            pl.BlockSpec(b_packed.shape, lambda i: (0, 0)),          # packed biases
        ],
        out_specs=pl.BlockSpec((tb, n_actions), lambda i: (i, 0)),
        compiler_params=pltpu.CompilerParams(
            dimension_semantics=("parallel",),  # shard batch tiles across TCs on v7x
        ),
    )(x, w1, w2, w3, b_packed)

    # Padded batch rows contain relu(b)-propagated garbage -> slice them off.
    return out[:batch]


def init_dqn_params(key, n_observations, n_actions):
    """PyTorch nn.Linear-style init (uniform(-1/sqrt(fan_in), ...)), f32.
    Weights stored transposed: (in_features, out_features)."""
    dims = [(n_observations, HIDDEN1), (HIDDEN1, HIDDEN2), (HIDDEN2, n_actions)]
    params = []
    for fan_in, fan_out in dims:
        key, kw, kb = jax.random.split(key, 3)
        bound = 1.0 / jnp.sqrt(fan_in)
        w = jax.random.uniform(kw, (fan_in, fan_out), jnp.float32, -bound, bound)
        b = jax.random.uniform(kb, (1, fan_out), jnp.float32, -bound, bound)
        params += [w, b]
    return tuple(params)


def pack_params(params, n_actions):
    """Cast weights to bf16 (un-padded) and pack biases into one (3, >=128) f32 buffer.
    The bias buffer stays >= HIDDEN1 lanes wide so layer-1/2 bias slices are valid."""
    w1, b1, w2, b2, w3, b3 = params
    bias_lanes = _round_up(max(HIDDEN1, n_actions), LANE)
    b_packed = jnp.zeros((3, bias_lanes), jnp.float32)
    b_packed = b_packed.at[0, :HIDDEN1].set(b1[0])
    b_packed = b_packed.at[1, :HIDDEN2].set(b2[0])
    b_packed = b_packed.at[2, :n_actions].set(b3[0])
    return (
        w1.astype(jnp.bfloat16),
        w2.astype(jnp.bfloat16),
        w3.astype(jnp.bfloat16),
        b_packed,
    )


def dqn_reference(x, params):
    """Plain-JAX f32 reference for correctness checking."""
    w1, b1, w2, b2, w3, b3 = params
    h = jnp.maximum(x @ w1 + b1, 0.0)
    h = jnp.maximum(h @ w2 + b2, 0.0)
    return h @ w3 + b3


if __name__ == "__main__":
    key = jax.random.PRNGKey(0)
    n_observations = 8
    n_actions = 4

    key, kx1, kx2 = jax.random.split(key, 3)
    params = init_dqn_params(key, n_observations, n_actions)
    packed = pack_params(params, n_actions)

    # Small batch (single tile, padded only to the sublane multiple).
    x_small = jax.random.normal(kx1, (4, n_observations), jnp.float32)
    out_small = dqn_forward(x_small, packed)
    jax.block_until_ready(out_small)
    ref_small = dqn_reference(x_small, params)
    assert out_small.shape == (4, n_actions)
    # bf16 MXU inputs (f32 accumulate) -> loosened tolerance vs. pure-f32 reference.
    assert jnp.allclose(out_small, ref_small, atol=5e-2, rtol=5e-2)

    # Batch that is not a multiple of the sublane size -> exercises padding path.
    x_big = jax.random.normal(kx2, (300, n_observations), jnp.float32)
    out_big = dqn_forward(x_big, packed)
    jax.block_until_ready(out_big)
    ref_big = dqn_reference(x_big, params)
    assert out_big.shape == (300, n_actions)
    assert jnp.allclose(out_big, ref_big, atol=5e-2, rtol=5e-2)

    print("KERNEL_OK")
</pallas_src>

<mosaic_0001>
module attributes {stable_mosaic.version = 11 : i64} {
  func.func @dqn_kernel(%arg0: i32, %arg1: memref<16x8xf32, #tpu.memory_space<vmem>>, %arg2: memref<8x64xbf16, #tpu.memory_space<vmem>>, %arg3: memref<64x32xbf16, #tpu.memory_space<vmem>>, %arg4: memref<32x4xbf16, #tpu.memory_space<vmem>>, %arg5: memref<3x128xf32, #tpu.memory_space<vmem>>, %arg6: memref<16x4xf32, #tpu.memory_space<vmem>>) attributes {dimension_semantics = [#tpu.dimension_semantics<parallel>], iteration_bounds = array<i64: 1>, scalar_prefetch = 0 : i64, scratch_operands = 0 : i64, tpu.core_type = #tpu.core_type<tc>, window_params = [{transform_indices = @transform_0, window_bounds = array<i64: 16, 8>}, {pipeline_mode = #tpu.pipeline_mode<synchronous>, transform_indices = @transform_1, window_bounds = array<i64: 8, 64>}, {pipeline_mode = #tpu.pipeline_mode<synchronous>, transform_indices = @transform_2, window_bounds = array<i64: 64, 32>}, {pipeline_mode = #tpu.pipeline_mode<synchronous>, transform_indices = @transform_3, window_bounds = array<i64: 32, 4>}, {pipeline_mode = #tpu.pipeline_mode<synchronous>, transform_indices = @transform_4, window_bounds = array<i64: 3, 128>}, {transform_indices = @transform_5, window_bounds = array<i64: 16, 4>}]} {
    %c0 = arith.constant 0 : index
    %c0_0 = arith.constant 0 : index
    %0 = vector.load %arg1[%c0, %c0_0] : memref<16x8xf32, #tpu.memory_space<vmem>>, vector<16x8xf32>
    %1 = arith.truncf %0 : vector<16x8xf32> to vector<16x8xbf16>
    %c0_1 = arith.constant 0 : index
    %c0_2 = arith.constant 0 : index
    %2 = vector.load %arg2[%c0_1, %c0_2] : memref<8x64xbf16, #tpu.memory_space<vmem>>, vector<8x64xbf16>
    %cst = arith.constant dense<0.000000e+00> : vector<16x64xf32>
    %3 = tpu.matmul %1, %2, %cst {dimension_numbers = #tpu.dot_dimension_numbers<[1], [0], [0], [1], [0, 0, 1, 1], [], []>} : vector<16x8xbf16>, vector<8x64xbf16>, vector<16x64xf32> -> vector<16x64xf32>
    %c0_3 = arith.constant 0 : index
    %c0_4 = arith.constant 0 : index
    %4 = vector.load %arg5[%c0_3, %c0_4] : memref<3x128xf32, #tpu.memory_space<vmem>>, vector<1x64xf32>
    %5 = vector.broadcast %4 : vector<1x64xf32> to vector<16x64xf32>
    %6 = arith.addf %3, %5 : vector<16x64xf32>
    %cst_5 = arith.constant 0.000000e+00 : f32
    %7 = vector.broadcast %cst_5 : f32 to vector<16x64xf32>
    %8 = arith.maximumf %6, %7 : vector<16x64xf32>
    %9 = arith.truncf %8 : vector<16x64xf32> to vector<16x64xbf16>
    %c0_6 = arith.constant 0 : index
    %c0_7 = arith.constant 0 : index
    %10 = vector.load %arg3[%c0_6, %c0_7] : memref<64x32xbf16, #tpu.memory_space<vmem>>, vector<64x32xbf16>
    %cst_8 = arith.constant dense<0.000000e+00> : vector<16x32xf32>
    %11 = tpu.matmul %9, %10, %cst_8 {dimension_numbers = #tpu.dot_dimension_numbers<[1], [0], [0], [1], [0, 0, 1, 1], [], []>} : vector<16x64xbf16>, vector<64x32xbf16>, vector<16x32xf32> -> vector<16x32xf32>
    %c1 = arith.constant 1 : index
    %c0_9 = arith.constant 0 : index
    %12 = vector.load %arg5[%c1, %c0_9] : memref<3x128xf32, #tpu.memory_space<vmem>>, vector<1x32xf32>
    %13 = vector.broadcast %12 : vector<1x32xf32> to vector<16x32xf32>
    %14 = arith.addf %11, %13 : vector<16x32xf32>
    %cst_10 = arith.constant 0.000000e+00 : f32
    %15 = vector.broadcast %cst_10 : f32 to vector<16x32xf32>
    %16 = arith.maximumf %14, %15 : vector<16x32xf32>
    %17 = arith.truncf %16 : vector<16x32xf32> to vector<16x32xbf16>
    %c0_11 = arith.constant 0 : index
    %c0_12 = arith.constant 0 : index
    %18 = vector.load %arg4[%c0_11, %c0_12] : memref<32x4xbf16, #tpu.memory_space<vmem>>, vector<32x4xbf16>
    %cst_13 = arith.constant dense<0.000000e+00> : vector<16x4xf32>
    %19 = tpu.matmul %17, %18, %cst_13 {dimension_numbers = #tpu.dot_dimension_numbers<[1], [0], [0], [1], [0, 0, 1, 1], [], []>} : vector<16x32xbf16>, vector<32x4xbf16>, vector<16x4xf32> -> vector<16x4xf32>
    %c2 = arith.constant 2 : index
    %c0_14 = arith.constant 0 : index
    %20 = vector.load %arg5[%c2, %c0_14] : memref<3x128xf32, #tpu.memory_space<vmem>>, vector<1x4xf32>
    %21 = vector.broadcast %20 : vector<1x4xf32> to vector<16x4xf32>
    %22 = arith.addf %19, %21 : vector<16x4xf32>
    %c0_15 = arith.constant 0 : index
    %c0_16 = arith.constant 0 : index
    %23 = vector.load %arg6[%c0_15, %c0_16] : memref<16x4xf32, #tpu.memory_space<vmem>>, vector<16x4xf32>
    tpu.vector_store %arg6[%c0_15, %c0_16], %22 {strides = array<i32>} : memref<16x4xf32, #tpu.memory_space<vmem>>, vector<16x4xf32>,
    return
  }
  func.func @transform_0(%arg0: i32) -> (i32, i32) {
    %c0_i32 = arith.constant 0 : i32
    %c0_i32_0 = arith.constant 0 : i32
    return %arg0, %c0_i32 : i32, i32
  }
  func.func @transform_1(%arg0: i32) -> (i32, i32) {
    %c0_i32 = arith.constant 0 : i32
    %c0_i32_0 = arith.constant 0 : i32
    %c0_i32_1 = arith.constant 0 : i32
    return %c0_i32, %c0_i32_0 : i32, i32
  }
  func.func @transform_2(%arg0: i32) -> (i32, i32) {
    %c0_i32 = arith.constant 0 : i32
    %c0_i32_0 = arith.constant 0 : i32
    %c0_i32_1 = arith.constant 0 : i32
    return %c0_i32, %c0_i32_0 : i32, i32
  }
  func.func @transform_3(%arg0: i32) -> (i32, i32) {
    %c0_i32 = arith.constant 0 : i32
    %c0_i32_0 = arith.constant 0 : i32
    %c0_i32_1 = arith.constant 0 : i32
    return %c0_i32, %c0_i32_0 : i32, i32
  }
  func.func @transform_4(%arg0: i32) -> (i32, i32) {
    %c0_i32 = arith.constant 0 : i32
    %c0_i32_0 = arith.constant 0 : i32
    %c0_i32_1 = arith.constant 0 : i32
    return %c0_i32, %c0_i32_0 : i32, i32
  }
  func.func @transform_5(%arg0: i32) -> (i32, i32) {
    %c0_i32 = arith.constant 0 : i32
    %c0_i32_0 = arith.constant 0 : i32
    return %arg0, %c0_i32 : i32, i32
  }
}

</mosaic_0001>

<bundles_post_ra>
// kernel: dqn_forward.1
= control target key start
LH: loop header
LB: loop body
LE: loop exit
PB: predicated region body
PF: predicated region fallthrough
CT: control target
= control target key end

     0   :  { %vm31_vm0 = vcmask 1043456   ;;  %vm27_vm1 = vcmask 64512   ;;  %vm86_vm2 = vcmask 523264   ;;  %vm125_vm3 = vcmask 261120   ;;  %s258_s1 = inlined_call_operand.vmem [shape: bf16[8,64], index: 1, kind: input, shape index: {}]   ;;  %s259_s0 = inlined_call_operand.vmem [shape: f32[16,8], index: 0, kind: input, shape index: {}]   ;;  %s260_s4 = inlined_call_operand.vmem [shape: f32[3,128], index: 4, kind: input, shape index: {}]   ;;  %s261_s2 = inlined_call_operand.vmem [shape: bf16[64,32], index: 2, kind: input, shape index: {}]   ;;  %s262_s3 = inlined_call_operand.vmem [shape: bf16[32,4], index: 3, kind: input, shape index: {}]   ;;  %s263_s5 = inlined_call_operand.vmem [shape: f32[16,4], index: 5, kind: output, shape index: {}]  }
   0x1   :  { %v24_v0 = vld [vmem:[%s258_s1] sm:$0xf]  ;;  %v22_v2 = vld [vmem:[%s259_s0 + $0x8] sm:$0xff]  ;;  %v180_v5 = vld [vmem:[%s261_s2 + $0x18] sm:$0xff]  ;;  %vm143_vm4 = vcmask 31744  }
   0x2   :  { %v21_v1 = vld [vmem:[%s259_s0] sm:$0xff]  ;;  %v33_v3 = vsel %vm31_vm0, %v24_v0, 0  ;;  %94 = vmatpush.bf16.msra.mxu1 %v180_v5  ;;  %v179_v6 = vld [vmem:[%s261_s2 + $0x10] sm:$0xff]  ;;  %v178_v7 = vld [vmem:[%s261_s2 + $0x8] sm:$0xff] }
   0x3   :  { %v23_v4 = vpack.c.bf16 %v22_v2, %v21_v1  ;;  %42 = vmatpush.bf16.msra.mxu0 %v33_v3  ;;  %v177_v8 = vld [vmem:[%s261_s2] sm:$0xff]  ;;  %v182_v17 = vld [vmem:[%s262_s3 + $0x8] sm:$0xff] }
   0x4   :  { %v183_v10 = vld [vmem:[%s260_s4] ss:$0 sm:$0xff]  ;;  %135 = vmatpush.bf16.msra.mxu2 %v182_v17  ;;  %v184_v20 = vld [vmem:[%s260_s4 + $0x1] ss:$0 sm:$0xff]  ;;  %v185_v27 = vld [vmem:[%s260_s4 + $0x2] ss:$0 sm:$0xff] }
   0x5   :  { %v181_v18 = vld [vmem:[%s262_s3] sm:$0xff] }
   0x6   :  { %150 = vmatmul.msk.bf16.vlgmr.msra.gmra.mxu0 %vm27_vm1, %v23_v4  ;;  %95 = vmatpush.bf16.msra.mxu1 %v179_v6 }
   0x8   :  { %136 = vmatpush.bf16.msra.mxu2 %v181_v18 }
   0xa   :  { %96 = vmatpush.bf16.msra.mxu1 %v178_v7 }
   0xe   :  { %97 = vmatpush.bf16.msra.mxu1 %v177_v8 }
  0x83   :  { %v44_v9 = vpop.f32.mrf.mxu0 }
  0x84   :  { %v45_v11 = vadd.f32 %v183_v10, %v44_v9 }
  0x86   :  { %v49_v14 = vmax.f32 %v45_v11, 0.0 }
  0x8b   :  { %v46_v12 = vpop.f32.mrf.mxu0 }
  0x8c   :  { %v47_v13 = vadd.f32 %v183_v10, %v46_v12 }
  0x8e   :  { %v50_v15 = vmax.f32 %v47_v13, 0.0 }
  0x90   :  { %v51_v16 = vpack.c.bf16 %v50_v15, %v49_v14 }
  0x92   :  { %167 = vmatmul.msk.bf16.vlgmr.msra.gmra.mxu1 %vm86_vm2, %v51_v16 }
 0x10f   :  { %v99_v19 = vpop.f32.mrf.mxu1 }
 0x110   :  { %v100_v21 = vadd.f32 %v184_v20, %v99_v19 }
 0x112   :  { %v104_v24 = vmax.f32 %v100_v21, 0.0 }
 0x117   :  { %v101_v22 = vpop.f32.mrf.mxu1 }
 0x118   :  { %v102_v23 = vadd.f32 %v184_v20, %v101_v22 }
 0x11a   :  { %v105_v25 = vmax.f32 %v102_v23, 0.0 }
 0x11c   :  { %v106_v26 = vpack.c.bf16 %v105_v25, %v104_v24 }
 0x11e   :  { %176 = vmatmul.msk.bf16.vlgmr.msra.gmra.mxu2 %vm125_vm3, %v106_v26 }
 0x1a1   :  { %v138_v28 = vpop.f32.mrf.mxu2 }
 0x1a2   :  { %v139_v29 = vadd.f32 %v185_v27, %v138_v28 }
 0x1a4   :  { %144 = vst.msk [vmem:[%s263_s5] sm:$0xff] %vm143_vm4, %v139_v29 }
 0x1a9   :  { %v140_v30 = vpop.f32.mrf.mxu2 }
 0x1aa   :  { %v141_v31 = vadd.f32 %v185_v27, %v140_v30 }
 0x1ac   :  { %145 = vst.msk [vmem:[%s263_s5 + $0x8] sm:$0xff] %vm143_vm4, %v141_v31 }

</bundles_post_ra>
